<compile_context>
chip_gen: v7x
topology: tpu7x:2x2x1
jax: 0.10.0
libtpu: 0.0.40
codegen_flags: <defaults>
</compile_context>

<pallas_src>
import math

import jax
import jax.numpy as jnp
from jax.experimental import pallas as pl
from jax.experimental.pallas import tpu as pltpu


def _make_kernel(Bt, L, D, hd, G, n_hg):
    ghd = G * hd

    def kernel(x_ref, mbias_ref, causal_ref,
               wqkv_ref, bqkv_ref, wp_ref, bp_ref,
               o_ref, y_scr):
        hg = pl.program_id(1)

        # ---- fused per-group QKV projection: (Bt*L, D) @ (D, 3*ghd) ----
        # K = D (deep), N = 3*ghd (lane-dense); weights resident in VMEM and
        # selected with a leading-axis index (no per-step weight DMA).
        xf = x_ref[...].reshape(Bt * L, D)                         # bf16
        qkv = jnp.dot(xf, wqkv_ref[hg],
                      preferred_element_type=jnp.float32) + bqkv_ref[hg]
        qkv = qkv.astype(jnp.bfloat16)                             # (Bt*L, 3*ghd)

        # Additive mask bias (causal + key padding), hoisted out of the loop.
        bias = causal_ref[...][None, :, :] + mbias_ref[...]        # (Bt, L, L) f32

        ys = []
        for g in range(G):                                         # static unroll
            q = qkv[:, g * hd:(g + 1) * hd].reshape(Bt, L, hd)
            k = qkv[:, ghd + g * hd:ghd + (g + 1) * hd].reshape(Bt, L, hd)
            v = qkv[:, 2 * ghd + g * hd:2 * ghd + (g + 1) * hd].reshape(Bt, L, hd)

            # Scores: contract last dims directly (no K transpose), f32 acc.
            att = jnp.einsum('bqd,bkd->bqk', q, k,
                             preferred_element_type=jnp.float32)   # (Bt, L, L)
            att = att + bias

            # Softmax in f32; reciprocal on the EUP.
            att = att - jnp.max(att, axis=-1, keepdims=True)
            p = jnp.exp(att)
            p = p * pl.reciprocal(jnp.sum(p, axis=-1, keepdims=True), approx=True)

            y = jnp.einsum('bqk,bkd->bqd', p.astype(jnp.bfloat16), v,
                           preferred_element_type=jnp.float32)     # (Bt, L, hd)
            ys.append(y.reshape(Bt * L, hd).astype(jnp.bfloat16))

        y_grp = ys[0] if G == 1 else jnp.concatenate(ys, axis=-1)  # (Bt*L, ghd)

        # Stash this group's y (bf16) for the final projection; the last group
        # is kept in registers, so no store is needed on the last step.
        @pl.when(hg < n_hg - 1)
        def _():
            y_scr[hg] = y_grp

        # ---- output projection, once per batch block (no per-step f32 RMW).
        # Done as a static sum of K=ghd matmuls over previously stored groups
        # (leading-axis scratch indexing only; avoids dynamic lane offsets).
        @pl.when(hg == n_hg - 1)
        def _():
            out = jnp.dot(y_grp, wp_ref[n_hg - 1],
                          preferred_element_type=jnp.float32)
            for h in range(n_hg - 1):
                out = out + jnp.dot(y_scr[h], wp_ref[h],
                                    preferred_element_type=jnp.float32)
            out = out + bp_ref[...]
            o_ref[...] = out.reshape(Bt, L, D).astype(o_ref.dtype)

    return kernel


def self_attention(x, m, params, n_head, block_b=None):
    """x: (B, L, D) float32; m: (B, L) float32 (1 = valid key, 0 = padded).

    params = (wq, bq, wk, bk, wv, bv, wp, bp) in PyTorch Linear layout
    (weights stored (out_features, in_features))."""
    B, L, D = x.shape
    H = n_head
    assert D % H == 0
    hd = D // H
    wq, bq, wk, bk, wv, bv, wp, bp = params
    scale = 1.0 / math.sqrt(hd)

    # ---- head grouping: G heads per grid step so G*hd is lane-dense ----
    G = 1
    for cand in range(1, H + 1):
        if H % cand == 0 and cand * hd <= 128:
            G = cand
    ghd = G * hd
    n_hg = H // G

    # ---- batch blocking: keep nb >= 2 (v7x 2 TCs), cap rows and VMEM ----
    if block_b is None:
        max_bb = max(1, B // 2)
        block_b = 1
        for cand in range(1, max_bb + 1):
            rows_ok = cand * L <= 1024
            vmem_ok = 3 * cand * G * L * L * 4 <= 24 * 1024 * 1024
            if B % cand == 0 and rows_ok and vmem_ok:
                block_b = cand
    assert B % block_b == 0
    nb = B // block_b
    BtL = block_b * L

    # ---- wrapper-side layout plumbing (free, outside the kernel) ----
    # PyTorch Linear computes x @ W.T; pre-transpose, fold 1/sqrt(hd) into q,
    # and fuse [q | k | v] columns per head group:
    #   wqkv3[g]: (D, 3*ghd)   bqkv3[g]: (1, 3*ghd)   wp3[g]: (ghd, D)
    def group_cols(wt):                              # (D, D) -> (n_hg, D, ghd)
        return jnp.transpose(wt.reshape(D, n_hg, ghd), (1, 0, 2))

    wqkv3 = jnp.concatenate(
        [group_cols(wq.T * scale), group_cols(wk.T), group_cols(wv.T)],
        axis=-1).astype(jnp.bfloat16)                            # (n_hg, D, 3ghd)
    bqkv3 = jnp.concatenate(
        [(bq * scale).reshape(n_hg, 1, ghd),
         bk.reshape(n_hg, 1, ghd),
         bv.reshape(n_hg, 1, ghd)], axis=-1).astype(jnp.float32)  # (n_hg, 1, 3ghd)
    wp3 = wp.T.reshape(n_hg, ghd, D).astype(jnp.bfloat16)         # (n_hg, ghd, D)
    bp2 = bp.reshape(1, D).astype(jnp.float32)

    # Precomputed additive masks (no in-kernel iota/compare/select).
    causal = jnp.where(jnp.tril(jnp.ones((L, L), dtype=bool)),
                       0.0, -10000.0).astype(jnp.float32)         # (L, L)
    mbias = ((1.0 - m) * -10000.0).reshape(B, 1, L).astype(jnp.float32)

    xb = x.astype(jnp.bfloat16)   # halve HBM->VMEM traffic; f32 accumulation

    x_map = lambda b, g: (b, 0, 0)
    const3 = lambda b, g: (0, 0, 0)
    const2 = lambda b, g: (0, 0)

    grid_spec = pltpu.PrefetchScalarGridSpec(
        num_scalar_prefetch=0,
        grid=(nb, n_hg),
        in_specs=[
            pl.BlockSpec((block_b, L, D), x_map),        # x
            pl.BlockSpec((block_b, 1, L), x_map),        # key-padding bias
            pl.BlockSpec((L, L), const2),                # causal bias (resident)
            pl.BlockSpec((n_hg, D, 3 * ghd), const3),    # fused qkv weights
            pl.BlockSpec((n_hg, 1, 3 * ghd), const3),    # fused qkv bias
            pl.BlockSpec((n_hg, ghd, D), const3),        # proj weights
            pl.BlockSpec((1, D), const2),                # proj bias
        ],
        out_specs=pl.BlockSpec((block_b, L, D), x_map),
        scratch_shapes=[pltpu.VMEM((n_hg, BtL, ghd), jnp.bfloat16)],
    )

    # Rough VMEM budget -> scoped limit (clamped; demo shapes use the floor).
    est = (2 * BtL * D * 2 + 2 * BtL * D * 4
           + n_hg * BtL * ghd * 2
           + 2 * (n_hg * D * 3 * ghd + n_hg * ghd * D) * 2
           + 4 * block_b * G * L * L * 4
           + 3 * BtL * 3 * ghd * 4)
    vmem_limit = int(min(96 * 1024 * 1024, max(32 * 1024 * 1024, 2 * est)))

    flops = 2 * B * L * D * 3 * D + 4 * B * H * L * L * hd + 2 * B * L * D * D
    bytes_accessed = int(xb.size * 2 + B * L * D * 4
                         + (wqkv3.size + wp3.size) * 2
                         + (mbias.size + causal.size + bqkv3.size + bp2.size) * 4)

    return pl.pallas_call(
        _make_kernel(block_b, L, D, hd, G, n_hg),
        out_shape=jax.ShapeDtypeStruct((B, L, D), jnp.float32),
        grid_spec=grid_spec,
        compiler_params=pltpu.CompilerParams(
            # batch blocks independent; head-group axis writes output at the end.
            dimension_semantics=("parallel", "arbitrary"),
            vmem_limit_bytes=vmem_limit,
        ),
        cost_estimate=pl.CostEstimate(
            flops=flops,
            transcendentals=B * H * L * L,
            bytes_accessed=bytes_accessed),
    )(xb, mbias, causal, wqkv3, bqkv3, wp3, bp2)


def _orthogonal(key, n, gain):
    """Deterministic orthogonal init (torch.nn.init.orthogonal_-style)."""
    a = jax.random.normal(key, (n, n), dtype=jnp.float32)
    q, r = jnp.linalg.qr(a)
    q = q * jnp.sign(jnp.diagonal(r))
    return (gain * q).astype(jnp.float32)


def make_params(key, D, gain=0.01):
    ks = jax.random.split(key, 4)
    zb = jnp.zeros((D,), jnp.float32)
    return (_orthogonal(ks[0], D, gain), zb,
            _orthogonal(ks[1], D, gain), zb,
            _orthogonal(ks[2], D, gain), zb,
            _orthogonal(ks[3], D, gain), zb)


def reference(x, m, params, n_head):
    """Pure-JAX f32 reference mirroring the PyTorch forward."""
    B, L, D = x.shape
    hd = D // n_head
    wq, bq, wk, bk, wv, bv, wp, bp = params
    q = (x @ wq.T + bq).reshape(B, L, n_head, hd).transpose(0, 2, 1, 3)
    k = (x @ wk.T + bk).reshape(B, L, n_head, hd).transpose(0, 2, 1, 3)
    v = (x @ wv.T + bv).reshape(B, L, n_head, hd).transpose(0, 2, 1, 3)
    att = jnp.einsum('bhqd,bhkd->bhqk', q, k) / math.sqrt(hd)
    causal = jnp.tril(jnp.ones((1, 1, L, L), bool))
    att = jnp.where(causal, att, -10000.0)
    att = att + ((1.0 - m) * -10000.0)[:, None, None, :]
    att = jax.nn.softmax(att, axis=-1)
    y = jnp.einsum('bhqk,bhkd->bhqd', att, v).transpose(0, 2, 1, 3).reshape(B, L, D)
    return y @ wp.T + bp


if __name__ == "__main__":
    B, L, D, H = 2, 8, 32, 4
    key = jax.random.PRNGKey(0)
    kx, kp = jax.random.split(key)

    x = jax.random.normal(kx, (B, L, D), dtype=jnp.float32)
    # padding mask: batch 0 fully valid, batch 1 has the last 3 positions padded
    m = jnp.array([[1.0] * L,
                   [1.0] * (L - 3) + [0.0] * 3], dtype=jnp.float32)

    params = make_params(kp, D)

    y = self_attention(x, m, params, H)
    y = jax.block_until_ready(y)

    y_ref = reference(x, m, params, H)
    # bf16 MXU operands + additive causal bias + approx reciprocal -> relaxed tol.
    assert jnp.allclose(y, y_ref, atol=5e-5, rtol=3e-2), "mismatch vs reference"

    print("KERNEL_OK")
</pallas_src>

<mosaic_0001>
module attributes {stable_mosaic.version = 11 : i64} {
  func.func @kernel(%arg0: i32, %arg1: i32, %arg2: memref<1x8x32xbf16, #tpu.memory_space<vmem>>, %arg3: memref<1x1x8xf32, #tpu.memory_space<vmem>>, %arg4: memref<8x8xf32, #tpu.memory_space<vmem>>, %arg5: memref<1x32x96xbf16, #tpu.memory_space<vmem>>, %arg6: memref<1x1x96xf32, #tpu.memory_space<vmem>>, %arg7: memref<1x32x32xbf16, #tpu.memory_space<vmem>>, %arg8: memref<1x32xf32, #tpu.memory_space<vmem>>, %arg9: memref<1x8x32xf32, #tpu.memory_space<vmem>>, %arg10: memref<1x8x32xbf16, #tpu.memory_space<vmem>>) attributes {dimension_semantics = [#tpu.dimension_semantics<parallel>, #tpu.dimension_semantics<arbitrary>], iteration_bounds = array<i64: 2, 1>, scalar_prefetch = 0 : i64, scratch_operands = 1 : i64, tpu.core_type = #tpu.core_type<tc>, window_params = [{transform_indices = @transform_0, window_bounds = array<i64: 1, 8, 32>}, {transform_indices = @transform_1, window_bounds = array<i64: 1, 1, 8>}, {pipeline_mode = #tpu.pipeline_mode<synchronous>, transform_indices = @transform_2, window_bounds = array<i64: 8, 8>}, {pipeline_mode = #tpu.pipeline_mode<synchronous>, transform_indices = @transform_3, window_bounds = array<i64: 1, 32, 96>}, {pipeline_mode = #tpu.pipeline_mode<synchronous>, transform_indices = @transform_4, window_bounds = array<i64: 1, 1, 96>}, {pipeline_mode = #tpu.pipeline_mode<synchronous>, transform_indices = @transform_5, window_bounds = array<i64: 1, 32, 32>}, {pipeline_mode = #tpu.pipeline_mode<synchronous>, transform_indices = @transform_6, window_bounds = array<i64: 1, 32>}, {transform_indices = @transform_7, window_bounds = array<i64: 1, 8, 32>}]} {
    %c0 = arith.constant 0 : index
    %c0_0 = arith.constant 0 : index
    %c0_1 = arith.constant 0 : index
    %0 = vector.load %arg2[%c0, %c0_0, %c0_1] : memref<1x8x32xbf16, #tpu.memory_space<vmem>>, vector<1x8x32xbf16>
    %1 = vector.shape_cast %0 : vector<1x8x32xbf16> to vector<8x32xbf16>
    %2 = arith.index_cast %arg1 : i32 to index
    %c0_2 = arith.constant 0 : index
    %c0_3 = arith.constant 0 : index
    %3 = vector.load %arg5[%2, %c0_2, %c0_3] : memref<1x32x96xbf16, #tpu.memory_space<vmem>>, vector<1x32x96xbf16>
    %4 = vector.shape_cast %3 : vector<1x32x96xbf16> to vector<32x96xbf16>
    %cst = arith.constant dense<0.000000e+00> : vector<8x96xf32>
    %5 = tpu.matmul %1, %4, %cst {dimension_numbers = #tpu.dot_dimension_numbers<[1], [0], [0], [1], [0, 0, 1, 1], [], []>} : vector<8x32xbf16>, vector<32x96xbf16>, vector<8x96xf32> -> vector<8x96xf32>
    %6 = arith.index_cast %arg1 : i32 to index
    %c0_4 = arith.constant 0 : index
    %c0_5 = arith.constant 0 : index
    %7 = vector.load %arg6[%6, %c0_4, %c0_5] : memref<1x1x96xf32, #tpu.memory_space<vmem>>, vector<1x1x96xf32>
    %8 = vector.shape_cast %7 : vector<1x1x96xf32> to vector<1x96xf32>
    %9 = vector.broadcast %8 : vector<1x96xf32> to vector<8x96xf32>
    %10 = arith.addf %5, %9 : vector<8x96xf32>
    %11 = arith.truncf %10 : vector<8x96xf32> to vector<8x96xbf16>
    %c0_6 = arith.constant 0 : index
    %c0_7 = arith.constant 0 : index
    %12 = vector.load %arg4[%c0_6, %c0_7] : memref<8x8xf32, #tpu.memory_space<vmem>>, vector<8x8xf32>
    %13 = vector.shape_cast %12 : vector<8x8xf32> to vector<1x8x8xf32>
    %c0_8 = arith.constant 0 : index
    %c0_9 = arith.constant 0 : index
    %c0_10 = arith.constant 0 : index
    %14 = vector.load %arg3[%c0_8, %c0_9, %c0_10] : memref<1x1x8xf32, #tpu.memory_space<vmem>>, vector<1x1x8xf32>
    %15 = vector.broadcast %14 : vector<1x1x8xf32> to vector<1x8x8xf32>
    %16 = arith.addf %13, %15 : vector<1x8x8xf32>
    %17 = vector.extract_strided_slice %11 {offsets = [0, 0], sizes = [8, 8], strides = [1, 1]} : vector<8x96xbf16> to vector<8x8xbf16>
    %18 = vector.shape_cast %17 : vector<8x8xbf16> to vector<1x8x8xbf16>
    %19 = vector.extract_strided_slice %11 {offsets = [0, 32], sizes = [8, 8], strides = [1, 1]} : vector<8x96xbf16> to vector<8x8xbf16>
    %20 = vector.shape_cast %19 : vector<8x8xbf16> to vector<1x8x8xbf16>
    %21 = vector.extract_strided_slice %11 {offsets = [0, 64], sizes = [8, 8], strides = [1, 1]} : vector<8x96xbf16> to vector<8x8xbf16>
    %22 = vector.shape_cast %21 : vector<8x8xbf16> to vector<1x8x8xbf16>
    "tpu.trace_start"() <{level = 10 : i32, message = "bqd,bkd->bqk"}> : () -> ()
    %cst_11 = arith.constant dense<0.000000e+00> : vector<1x8x8xf32>
    %23 = tpu.matmul %18, %20, %cst_11 {dimension_numbers = #tpu.dot_dimension_numbers<[2], [2], [1], [1], [0, 0, 0, 1, 1, 1], [0], [0]>} : vector<1x8x8xbf16>, vector<1x8x8xbf16>, vector<1x8x8xf32> -> vector<1x8x8xf32>
    "tpu.trace_stop"() : () -> ()
    %24 = arith.addf %23, %16 : vector<1x8x8xf32>
    %cst_12 = arith.constant dense<0xFF800000> : vector<1x8xf32>
    %25 = vector.multi_reduction <maximumf>, %24, %cst_12 [2] : vector<1x8x8xf32> to vector<1x8xf32>
    %26 = vector.shape_cast %25 : vector<1x8xf32> to vector<1x8x1xf32>
    %27 = vector.broadcast %26 : vector<1x8x1xf32> to vector<1x8x8xf32>
    %28 = arith.subf %24, %27 : vector<1x8x8xf32>
    %29 = math.exp %28 : vector<1x8x8xf32>
    %cst_13 = arith.constant dense<0.000000e+00> : vector<1x8xf32>
    %30 = vector.multi_reduction <add>, %29, %cst_13 [2] : vector<1x8x8xf32> to vector<1x8xf32>
    %31 = vector.shape_cast %30 : vector<1x8xf32> to vector<1x8x1xf32>
    %32 = tpu.reciprocal %31 {approx = true} : vector<1x8x1xf32> -> vector<1x8x1xf32>
    %33 = vector.broadcast %32 : vector<1x8x1xf32> to vector<1x8x8xf32>
    %34 = arith.mulf %29, %33 : vector<1x8x8xf32>
    %35 = arith.truncf %34 : vector<1x8x8xf32> to vector<1x8x8xbf16>
    "tpu.trace_start"() <{level = 10 : i32, message = "bqk,bkd->bqd"}> : () -> ()
    %cst_14 = arith.constant dense<0.000000e+00> : vector<1x8x8xf32>
    %36 = tpu.matmul %35, %22, %cst_14 {dimension_numbers = #tpu.dot_dimension_numbers<[2], [1], [1], [2], [0, 0, 0, 1, 1, 2], [0], [0]>} : vector<1x8x8xbf16>, vector<1x8x8xbf16>, vector<1x8x8xf32> -> vector<1x8x8xf32>
    "tpu.trace_stop"() : () -> ()
    %37 = vector.shape_cast %36 : vector<1x8x8xf32> to vector<8x8xf32>
    %38 = arith.truncf %37 : vector<8x8xf32> to vector<8x8xbf16>
    %39 = vector.extract_strided_slice %11 {offsets = [0, 8], sizes = [8, 8], strides = [1, 1]} : vector<8x96xbf16> to vector<8x8xbf16>
    %40 = vector.shape_cast %39 : vector<8x8xbf16> to vector<1x8x8xbf16>
    %41 = vector.extract_strided_slice %11 {offsets = [0, 40], sizes = [8, 8], strides = [1, 1]} : vector<8x96xbf16> to vector<8x8xbf16>
    %42 = vector.shape_cast %41 : vector<8x8xbf16> to vector<1x8x8xbf16>
    %43 = vector.extract_strided_slice %11 {offsets = [0, 72], sizes = [8, 8], strides = [1, 1]} : vector<8x96xbf16> to vector<8x8xbf16>
    %44 = vector.shape_cast %43 : vector<8x8xbf16> to vector<1x8x8xbf16>
    "tpu.trace_start"() <{level = 10 : i32, message = "bqd,bkd->bqk"}> : () -> ()
    %cst_15 = arith.constant dense<0.000000e+00> : vector<1x8x8xf32>
    %45 = tpu.matmul %40, %42, %cst_15 {dimension_numbers = #tpu.dot_dimension_numbers<[2], [2], [1], [1], [0, 0, 0, 1, 1, 1], [0], [0]>} : vector<1x8x8xbf16>, vector<1x8x8xbf16>, vector<1x8x8xf32> -> vector<1x8x8xf32>
    "tpu.trace_stop"() : () -> ()
    %46 = arith.addf %45, %16 : vector<1x8x8xf32>
    %cst_16 = arith.constant dense<0xFF800000> : vector<1x8xf32>
    %47 = vector.multi_reduction <maximumf>, %46, %cst_16 [2] : vector<1x8x8xf32> to vector<1x8xf32>
    %48 = vector.shape_cast %47 : vector<1x8xf32> to vector<1x8x1xf32>
    %49 = vector.broadcast %48 : vector<1x8x1xf32> to vector<1x8x8xf32>
    %50 = arith.subf %46, %49 : vector<1x8x8xf32>
    %51 = math.exp %50 : vector<1x8x8xf32>
    %cst_17 = arith.constant dense<0.000000e+00> : vector<1x8xf32>
    %52 = vector.multi_reduction <add>, %51, %cst_17 [2] : vector<1x8x8xf32> to vector<1x8xf32>
    %53 = vector.shape_cast %52 : vector<1x8xf32> to vector<1x8x1xf32>
    %54 = tpu.reciprocal %53 {approx = true} : vector<1x8x1xf32> -> vector<1x8x1xf32>
    %55 = vector.broadcast %54 : vector<1x8x1xf32> to vector<1x8x8xf32>
    %56 = arith.mulf %51, %55 : vector<1x8x8xf32>
    %57 = arith.truncf %56 : vector<1x8x8xf32> to vector<1x8x8xbf16>
    "tpu.trace_start"() <{level = 10 : i32, message = "bqk,bkd->bqd"}> : () -> ()
    %cst_18 = arith.constant dense<0.000000e+00> : vector<1x8x8xf32>
    %58 = tpu.matmul %57, %44, %cst_18 {dimension_numbers = #tpu.dot_dimension_numbers<[2], [1], [1], [2], [0, 0, 0, 1, 1, 2], [0], [0]>} : vector<1x8x8xbf16>, vector<1x8x8xbf16>, vector<1x8x8xf32> -> vector<1x8x8xf32>
    "tpu.trace_stop"() : () -> ()
    %59 = vector.shape_cast %58 : vector<1x8x8xf32> to vector<8x8xf32>
    %60 = arith.truncf %59 : vector<8x8xf32> to vector<8x8xbf16>
    %61 = vector.extract_strided_slice %11 {offsets = [0, 16], sizes = [8, 8], strides = [1, 1]} : vector<8x96xbf16> to vector<8x8xbf16>
    %62 = vector.shape_cast %61 : vector<8x8xbf16> to vector<1x8x8xbf16>
    %63 = vector.extract_strided_slice %11 {offsets = [0, 48], sizes = [8, 8], strides = [1, 1]} : vector<8x96xbf16> to vector<8x8xbf16>
    %64 = vector.shape_cast %63 : vector<8x8xbf16> to vector<1x8x8xbf16>
    %65 = vector.extract_strided_slice %11 {offsets = [0, 80], sizes = [8, 8], strides = [1, 1]} : vector<8x96xbf16> to vector<8x8xbf16>
    %66 = vector.shape_cast %65 : vector<8x8xbf16> to vector<1x8x8xbf16>
    "tpu.trace_start"() <{level = 10 : i32, message = "bqd,bkd->bqk"}> : () -> ()
    %cst_19 = arith.constant dense<0.000000e+00> : vector<1x8x8xf32>
    %67 = tpu.matmul %62, %64, %cst_19 {dimension_numbers = #tpu.dot_dimension_numbers<[2], [2], [1], [1], [0, 0, 0, 1, 1, 1], [0], [0]>} : vector<1x8x8xbf16>, vector<1x8x8xbf16>, vector<1x8x8xf32> -> vector<1x8x8xf32>
    "tpu.trace_stop"() : () -> ()
    %68 = arith.addf %67, %16 : vector<1x8x8xf32>
    %cst_20 = arith.constant dense<0xFF800000> : vector<1x8xf32>
    %69 = vector.multi_reduction <maximumf>, %68, %cst_20 [2] : vector<1x8x8xf32> to vector<1x8xf32>
    %70 = vector.shape_cast %69 : vector<1x8xf32> to vector<1x8x1xf32>
    %71 = vector.broadcast %70 : vector<1x8x1xf32> to vector<1x8x8xf32>
    %72 = arith.subf %68, %71 : vector<1x8x8xf32>
    %73 = math.exp %72 : vector<1x8x8xf32>
    %cst_21 = arith.constant dense<0.000000e+00> : vector<1x8xf32>
    %74 = vector.multi_reduction <add>, %73, %cst_21 [2] : vector<1x8x8xf32> to vector<1x8xf32>
    %75 = vector.shape_cast %74 : vector<1x8xf32> to vector<1x8x1xf32>
    %76 = tpu.reciprocal %75 {approx = true} : vector<1x8x1xf32> -> vector<1x8x1xf32>
    %77 = vector.broadcast %76 : vector<1x8x1xf32> to vector<1x8x8xf32>
    %78 = arith.mulf %73, %77 : vector<1x8x8xf32>
    %79 = arith.truncf %78 : vector<1x8x8xf32> to vector<1x8x8xbf16>
    "tpu.trace_start"() <{level = 10 : i32, message = "bqk,bkd->bqd"}> : () -> ()
    %cst_22 = arith.constant dense<0.000000e+00> : vector<1x8x8xf32>
    %80 = tpu.matmul %79, %66, %cst_22 {dimension_numbers = #tpu.dot_dimension_numbers<[2], [1], [1], [2], [0, 0, 0, 1, 1, 2], [0], [0]>} : vector<1x8x8xbf16>, vector<1x8x8xbf16>, vector<1x8x8xf32> -> vector<1x8x8xf32>
    "tpu.trace_stop"() : () -> ()
    %81 = vector.shape_cast %80 : vector<1x8x8xf32> to vector<8x8xf32>
    %82 = arith.truncf %81 : vector<8x8xf32> to vector<8x8xbf16>
    %83 = vector.extract_strided_slice %11 {offsets = [0, 24], sizes = [8, 8], strides = [1, 1]} : vector<8x96xbf16> to vector<8x8xbf16>
    %84 = vector.shape_cast %83 : vector<8x8xbf16> to vector<1x8x8xbf16>
    %85 = vector.extract_strided_slice %11 {offsets = [0, 56], sizes = [8, 8], strides = [1, 1]} : vector<8x96xbf16> to vector<8x8xbf16>
    %86 = vector.shape_cast %85 : vector<8x8xbf16> to vector<1x8x8xbf16>
    %87 = vector.extract_strided_slice %11 {offsets = [0, 88], sizes = [8, 8], strides = [1, 1]} : vector<8x96xbf16> to vector<8x8xbf16>
    %88 = vector.shape_cast %87 : vector<8x8xbf16> to vector<1x8x8xbf16>
    "tpu.trace_start"() <{level = 10 : i32, message = "bqd,bkd->bqk"}> : () -> ()
    %cst_23 = arith.constant dense<0.000000e+00> : vector<1x8x8xf32>
    %89 = tpu.matmul %84, %86, %cst_23 {dimension_numbers = #tpu.dot_dimension_numbers<[2], [2], [1], [1], [0, 0, 0, 1, 1, 1], [0], [0]>} : vector<1x8x8xbf16>, vector<1x8x8xbf16>, vector<1x8x8xf32> -> vector<1x8x8xf32>
    "tpu.trace_stop"() : () -> ()
    %90 = arith.addf %89, %16 : vector<1x8x8xf32>
    %cst_24 = arith.constant dense<0xFF800000> : vector<1x8xf32>
    %91 = vector.multi_reduction <maximumf>, %90, %cst_24 [2] : vector<1x8x8xf32> to vector<1x8xf32>
    %92 = vector.shape_cast %91 : vector<1x8xf32> to vector<1x8x1xf32>
    %93 = vector.broadcast %92 : vector<1x8x1xf32> to vector<1x8x8xf32>
    %94 = arith.subf %90, %93 : vector<1x8x8xf32>
    %95 = math.exp %94 : vector<1x8x8xf32>
    %cst_25 = arith.constant dense<0.000000e+00> : vector<1x8xf32>
    %96 = vector.multi_reduction <add>, %95, %cst_25 [2] : vector<1x8x8xf32> to vector<1x8xf32>
    %97 = vector.shape_cast %96 : vector<1x8xf32> to vector<1x8x1xf32>
    %98 = tpu.reciprocal %97 {approx = true} : vector<1x8x1xf32> -> vector<1x8x1xf32>
    %99 = vector.broadcast %98 : vector<1x8x1xf32> to vector<1x8x8xf32>
    %100 = arith.mulf %95, %99 : vector<1x8x8xf32>
    %101 = arith.truncf %100 : vector<1x8x8xf32> to vector<1x8x8xbf16>
    "tpu.trace_start"() <{level = 10 : i32, message = "bqk,bkd->bqd"}> : () -> ()
    %cst_26 = arith.constant dense<0.000000e+00> : vector<1x8x8xf32>
    %102 = tpu.matmul %101, %88, %cst_26 {dimension_numbers = #tpu.dot_dimension_numbers<[2], [1], [1], [2], [0, 0, 0, 1, 1, 2], [0], [0]>} : vector<1x8x8xbf16>, vector<1x8x8xbf16>, vector<1x8x8xf32> -> vector<1x8x8xf32>
    "tpu.trace_stop"() : () -> ()
    %103 = vector.shape_cast %102 : vector<1x8x8xf32> to vector<8x8xf32>
    %104 = arith.truncf %103 : vector<8x8xf32> to vector<8x8xbf16>
    %105 = tpu.concatenate %38, %60, %82, %104 in 1 : vector<8x8xbf16>, vector<8x8xbf16>, vector<8x8xbf16>, vector<8x8xbf16> -> vector<8x32xbf16>
    %c0_i32 = arith.constant 0 : i32
    %106 = arith.cmpi slt, %arg1, %c0_i32 : i32
    %107 = arith.extui %106 : i1 to i32
    %c0_i32_27 = arith.constant 0 : i32
    %108 = arith.cmpi ne, %107, %c0_i32_27 : i32
    scf.if %108 {
      %112 = arith.index_cast %arg1 : i32 to index
      %c0_30 = arith.constant 0 : index
      %c0_31 = arith.constant 0 : index
      %113 = vector.load %arg10[%112, %c0_30, %c0_31] : memref<1x8x32xbf16, #tpu.memory_space<vmem>>, vector<1x8x32xbf16>
      %114 = vector.shape_cast %113 : vector<1x8x32xbf16> to vector<8x32xbf16>
      %115 = vector.shape_cast %105 : vector<8x32xbf16> to vector<1x8x32xbf16>
      tpu.vector_store %arg10[%112, %c0_30, %c0_31], %115 {strides = array<i32>} : memref<1x8x32xbf16, #tpu.memory_space<vmem>>, vector<1x8x32xbf16>,
    } else {
    }
    %c0_i32_28 = arith.constant 0 : i32
    %109 = arith.cmpi eq, %arg1, %c0_i32_28 : i32
    %110 = arith.extui %109 : i1 to i32
    %c0_i32_29 = arith.constant 0 : i32
    %111 = arith.cmpi ne, %110, %c0_i32_29 : i32
    scf.if %111 {
      %c0_30 = arith.constant 0 : index
      %c0_31 = arith.constant 0 : index
      %c0_32 = arith.constant 0 : index
      %112 = vector.load %arg7[%c0_30, %c0_31, %c0_32] : memref<1x32x32xbf16, #tpu.memory_space<vmem>>, vector<1x32x32xbf16>
      %113 = vector.shape_cast %112 : vector<1x32x32xbf16> to vector<32x32xbf16>
      %cst_33 = arith.constant dense<0.000000e+00> : vector<8x32xf32>
      %114 = tpu.matmul %105, %113, %cst_33 {dimension_numbers = #tpu.dot_dimension_numbers<[1], [0], [0], [1], [0, 0, 1, 1], [], []>} : vector<8x32xbf16>, vector<32x32xbf16>, vector<8x32xf32> -> vector<8x32xf32>
      %c0_34 = arith.constant 0 : index
      %c0_35 = arith.constant 0 : index
      %115 = vector.load %arg8[%c0_34, %c0_35] : memref<1x32xf32, #tpu.memory_space<vmem>>, vector<1x32xf32>
      %116 = vector.broadcast %115 : vector<1x32xf32> to vector<8x32xf32>
      %117 = arith.addf %114, %116 : vector<8x32xf32>
      %118 = vector.shape_cast %117 : vector<8x32xf32> to vector<1x8x32xf32>
      %c0_36 = arith.constant 0 : index
      %c0_37 = arith.constant 0 : index
      %c0_38 = arith.constant 0 : index
      %119 = vector.load %arg9[%c0_36, %c0_37, %c0_38] : memref<1x8x32xf32, #tpu.memory_space<vmem>>, vector<1x8x32xf32>
      tpu.vector_store %arg9[%c0_36, %c0_37, %c0_38], %118 {strides = array<i32>} : memref<1x8x32xf32, #tpu.memory_space<vmem>>, vector<1x8x32xf32>,
    } else {
    }
    return
  }
  func.func @transform_0(%arg0: i32, %arg1: i32) -> (i32, i32, i32) {
    %c0_i32 = arith.constant 0 : i32
    %c0_i32_0 = arith.constant 0 : i32
    %c0_i32_1 = arith.constant 0 : i32
    return %arg0, %c0_i32, %c0_i32_0 : i32, i32, i32
  }
  func.func @transform_1(%arg0: i32, %arg1: i32) -> (i32, i32, i32) {
    %c0_i32 = arith.constant 0 : i32
    %c0_i32_0 = arith.constant 0 : i32
    %c0_i32_1 = arith.constant 0 : i32
    return %arg0, %c0_i32, %c0_i32_0 : i32, i32, i32
  }
  func.func @transform_2(%arg0: i32, %arg1: i32) -> (i32, i32) {
    %c0_i32 = arith.constant 0 : i32
    %c0_i32_0 = arith.constant 0 : i32
    %c0_i32_1 = arith.constant 0 : i32
    return %c0_i32, %c0_i32_0 : i32, i32
  }
  func.func @transform_3(%arg0: i32, %arg1: i32) -> (i32, i32, i32) {
    %c0_i32 = arith.constant 0 : i32
    %c0_i32_0 = arith.constant 0 : i32
    %c0_i32_1 = arith.constant 0 : i32
    %c0_i32_2 = arith.constant 0 : i32
    return %c0_i32, %c0_i32_0, %c0_i32_1 : i32, i32, i32
  }
  func.func @transform_4(%arg0: i32, %arg1: i32) -> (i32, i32, i32) {
    %c0_i32 = arith.constant 0 : i32
    %c0_i32_0 = arith.constant 0 : i32
    %c0_i32_1 = arith.constant 0 : i32
    %c0_i32_2 = arith.constant 0 : i32
    return %c0_i32, %c0_i32_0, %c0_i32_1 : i32, i32, i32
  }
  func.func @transform_5(%arg0: i32, %arg1: i32) -> (i32, i32, i32) {
    %c0_i32 = arith.constant 0 : i32
    %c0_i32_0 = arith.constant 0 : i32
    %c0_i32_1 = arith.constant 0 : i32
    %c0_i32_2 = arith.constant 0 : i32
    return %c0_i32, %c0_i32_0, %c0_i32_1 : i32, i32, i32
  }
  func.func @transform_6(%arg0: i32, %arg1: i32) -> (i32, i32) {
    %c0_i32 = arith.constant 0 : i32
    %c0_i32_0 = arith.constant 0 : i32
    %c0_i32_1 = arith.constant 0 : i32
    return %c0_i32, %c0_i32_0 : i32, i32
  }
  func.func @transform_7(%arg0: i32, %arg1: i32) -> (i32, i32, i32) {
    %c0_i32 = arith.constant 0 : i32
    %c0_i32_0 = arith.constant 0 : i32
    %c0_i32_1 = arith.constant 0 : i32
    return %arg0, %c0_i32, %c0_i32_0 : i32, i32, i32
  }
}

</mosaic_0001>

<bundles_post_ra>
// kernel: tpu_custom_call.1
= control target key start
LH: loop header
LB: loop body
LE: loop exit
PB: predicated region body
PF: predicated region fallthrough
CT: control target
= control target key end

     0   :  { %s1999_s0 = inlined_call_operand.hbm [shape: bf16[2,8,32], index: 0, kind: input, shape index: {}]   ;;  %s2000_s1 = inlined_call_operand.vmem [shape: f32[2,1,8], index: 1, kind: input, shape index: {}]   ;;  %s2001_s2 = inlined_call_operand.hbm [shape: f32[8,8], index: 2, kind: input, shape index: {}]   ;;  %s2002_s3 = inlined_call_operand.hbm [shape: bf16[1,32,96], index: 3, kind: input, shape index: {}]   ;;  %s2003_s4 = inlined_call_operand.hbm [shape: f32[1,1,96], index: 4, kind: input, shape index: {}]   ;;  %s2004_s5 = inlined_call_operand.vmem [shape: bf16[1,32,32], index: 5, kind: input, shape index: {}]   ;;  %s2005_s6 = inlined_call_operand.vmem [shape: f32[1,32], index: 6, kind: input, shape index: {}]   ;;  %s2006_s7 = inlined_call_operand.hbm [shape: f32[2,8,32], index: 7, kind: output, shape index: {}]  }
   0x1   :  { %2013 = sst [smem:[#allocation18_spill]] %s2001_s2 }
   0x2   :  { %12 = vsyncpa [#allocation4], 0 }
   0x3   :  { %14 = vsyncpa [#allocation4 + $0x1], 0 }
   0x4   :  { %15 = vsyncpa [#allocation7], 0 }
   0x5   :  { %16 = vsyncpa [#allocation10], 0 }
   0x6   :  { %17 = vsyncpa [#allocation5], 0 }
   0x7   :  { %19 = vsyncpa [#allocation5 + $0x1], 0  ;;  %s1642_s24 = smov 0   ;;  %s1644_s25 = smov 0  }
   0x8   :  { %s1646_s26 = smov 0   ;;  %s1648_s27 = smov 0  }
   0x9   :  { %s1650_s28 = smov 0   ;;  %s1652_s29 = smov 0  }
   0xa LB: > { %2014 = sst [smem:[#allocation16_spill]] %s1557_s24  ;;  %s1120_s30 = sadd.s32 4294967295, %s1577_s29   ;;  %s1577_s29 = sphi %s1652_s29, %s25_s29   ;;  %s1573_s28 = sphi %s1650_s28, %s2038_s28   ;;  %s1569_s27 = sphi %s1648_s27, %s2037_s27   ;;  %s1565_s26 = sphi %s1646_s26, %s2036_s26   ;;  %s1561_s25 = sphi %s1644_s25, %s2035_s25   ;;  %s1557_s24 = sphi %s1642_s24, %s2034_s24  }
   0xb   : > { %s1121_s8 = sadd.s32 4294967294, %s1577_s29   ;;  %p57_p0 = scmp.ne.s32.totalorder %s1561_s25, %s1557_s24 }
   0xc   : > { %p1676_p1 = scmp.eq.s32.totalorder %s1120_s30, 0  ;;  %p1680_p2 = scmp.eq.s32.totalorder %s1120_s30, 1 }
   0xd   : > { %p218_p3 = scmp.eq.s32.totalorder %s1121_s8, 1  ;;  %p1122_p5 = scmp.ge.s32.totalorder %s1577_s29, 1 }
   0xe   : > { %s2015_s9 = scalar_select %p1676_p1, 1, 0 }
   0xf   : > { %s2016_s10 = scalar_select %p1680_p2, 1, 0 }
  0x10   : > { %p1686_p4 = por %p1676_p1, %p57_p0  ;;  %p1691_p6 = por %p218_p3, %p57_p0 }
  0x11   : > { %p225_p7 = scmp.lt.s32.totalorder %s1577_s29, 3  ;;  %s1579_s14 = smov [#allocation6]  }
  0x12   : > { %s2017_s11 = scalar_select %p1686_p4, 1, 0 }
  0x13   : > { %s2018_s12 = scalar_select %p1691_p6, 1, 0 }
  0x14   : > { %p1696_p8 = pnand %p1122_p5, %p225_p7  ;;  %s238_s15 = sshll.u32 %s1579_s14, 4  ;;  %s239_s15 = int_to_ptr.vmem [resolvable:$true] %s238_s15 }
  0x15   : > { %2019 = sst [smem:[#allocation17_spill]] %s2018_s12  ;;  %s1580_s16 = smov [#allocation8]  }
  0x16   : > { %s2020_s13 = scalar_select %p1696_p8, 1, 0 }
  0x17   : > { %p1258_p10 = pneg %p1696_p8  ;;  %s248_s17 = sshll.u32 %s1580_s16, 4  ;;  %s1709_s17 = int_to_ptr.vmem [resolvable:$true] %s248_s17 }
  0x18   : > { %s1581_s19 = smov [#allocation9]   ;;  %s2022_s2 = sld [smem:[#allocation18_spill]] }
  0x19   : > { %p1705_p11 = pnand %p1258_p10, %p1676_p1  ;;  %s1711_s20 = sshll.u32 %s1581_s19, 4  ;;  %s263_s20 = int_to_ptr.vmem [resolvable:$true] %s1711_s20 }
  0x1b   : > { %p1721_p13 = pneg %p1705_p11 }
  0x1e   : > { %s1373_s23 = scalar_lea.hbm %s2022_s2, 128 }
  0x1f   : > { %p1374_p12 = scmp.ne.s32.totalorder %s2022_s2, %s1373_s23  ;;  %p1380_p5 = scmp.lt.u32.totalorder %s1373_s23, %s2022_s2 }
  0x21   : > { %p1376_p0 = pnand %p1721_p13, %p1374_p12 }
  0x23   : > { %p1377_p3 = pneg %p1376_p0 }
  0x25   : > { %p1382_p7 = pnand %p1380_p5, %p1377_p3 }
  0x27   : > { %1385 = shalt.err (!%p1382_p7)
}
  0x28   : > { %s1386_s21 = scalar_lea.vmem %s239_s15, 128  ;;  %p1394_p1 = scmp.lt.s32.totalorder %s239_s15, %s239_s15 }
  0x29   : > { %p1387_p10 = scmp.ne.s32.totalorder %s239_s15, %s1386_s21  ;;  %p1395_p4 = scmp.lt.s32.totalorder %s1386_s21, %s1386_s21 }
  0x2b   : > { %p1389_p9 = pnand %p1387_p10, %p1721_p13  ;;  %p1396_p8 = por %p1395_p4, %p1394_p1 }
  0x2d   : > { %p1390_p6 = pneg %p1389_p9 }
  0x2f   : > { %p1397_p2 = pnand %p1396_p8, %p1390_p6 }
  0x31   : > { %1400 = shalt.err (!%p1397_p2)
}
  0x32   : > { %1261 = dma.hbm_to_vmem [thread:$0]  (!%p1705_p11), %s2022_s2, 128, %s239_s15, [#allocation7]  }
  0x33   : > { %s1401_s16 = scalar_lea.hbm %s2002_s3, 256 }
  0x34   : > { %p1402_p9 = scmp.ne.s32.totalorder %s2002_s3, %s1401_s16  ;;  %p1408_p2 = scmp.lt.u32.totalorder %s1401_s16, %s2002_s3 }
  0x36   : > { %p1404_p12 = pnand %p1402_p9, %p1721_p13 }
  0x38   : > { %p1405_p1 = pneg %p1404_p12 }
  0x3a   : > { %p1410_p4 = pnand %p1408_p2, %p1405_p1 }
  0x3c   : > { %1413 = shalt.err (!%p1410_p4)
}
  0x3d   : > { %s1414_s15 = scalar_lea.vmem %s1709_s17, 256  ;;  %p1422_p3 = scmp.lt.s32.totalorder %s1709_s17, %s1709_s17 }
  0x3e   : > { %p1415_p6 = scmp.ne.s32.totalorder %s1709_s17, %s1414_s15  ;;  %p1423_p5 = scmp.lt.s32.totalorder %s1414_s15, %s1414_s15 }
  0x40   : > { %p1417_p8 = pnand %p1415_p6, %p1721_p13  ;;  %p1424_p7 = por %p1423_p5, %p1422_p3 }
  0x42   : > { %p1418_p0 = pneg %p1417_p8 }
  0x44   : > { %p1425_p10 = pnand %p1424_p7, %p1418_p0 }
  0x46   : > { %1428 = shalt.err (!%p1425_p10)
}
  0x47   : > { %s1582_s12 = smov 64   ;;  %s1583_s24 = smov 4  }
  0x48   : > { %1264 = dma.hbm_to_vmem [thread:$0]  (!%p1705_p11), %s2002_s3, 256, %s1709_s17, [#allocation7], %s1582_s12, %s1582_s12, %s1583_s24  }
  0x49   : > { %s1429_s16 = scalar_lea.hbm %s2003_s4, 16 }
  0x4a   : > { %p1430_p9 = scmp.ne.s32.totalorder %s2003_s4, %s1429_s16  ;;  %p1436_p2 = scmp.lt.u32.totalorder %s1429_s16, %s2003_s4 }
  0x4c   : > { %p1432_p12 = pnand %p1430_p9, %p1721_p13 }
  0x4e   : > { %p1433_p1 = pneg %p1432_p12 }
  0x50   : > { %p1438_p4 = pnand %p1436_p2, %p1433_p1 }
  0x52   : > { %1441 = shalt.err (!%p1438_p4)
}
  0x53   : > { %s1442_s22 = scalar_lea.vmem %s263_s20, 16  ;;  %s1449_s17 = scalar_lea.vmem %s263_s20, 32 }
  0x54   : > { %p1443_p6 = scmp.ne.s32.totalorder %s263_s20, %s1442_s22  ;;  %p1450_p3 = scmp.lt.s32.totalorder %s263_s20, %s263_s20 }
  0x55   : > { %p1451_p5 = scmp.lt.s32.totalorder %s1449_s17, %s1442_s22 }
  0x56   : > { %p1445_p8 = pnand %p1443_p6, %p1721_p13 }
  0x57   : > { %p1452_p7 = por %p1451_p5, %p1450_p3 }
  0x58   : > { %p1446_p0 = pneg %p1445_p8 }
  0x5a   : > { %p1453_p10 = pnand %p1452_p7, %p1446_p0 }
  0x5c   : > { %1456 = shalt.err (!%p1453_p10)
}
  0x5d   : > { %1267 = dma.hbm_to_vmem [thread:$0]  (!%p1705_p11), %s2003_s4, 16, %s263_s20, [#allocation10]  }
  0x5e   : > { %s44_s2 = sadd.s32 1, %s1565_s26  ;;  %s37_s14 = sadd.s32 1, %s1573_s28 }
  0x5f   : > { %p51_p13 = scmp.ne.s32.totalorder %s1565_s26, %s1561_s25  ;;  %p39_p9 = scmp.ge.s32.totalorder %s37_s14, 2 }
  0x60   : > { %p52_p12 = scmp.eq.s32.totalorder %s1577_s29, 0  ;;  %p2024_p1 = scmp.ne.s32.totalorder %s2016_s10, 0 }
  0x61   : > { %p1279_p4 = scmp.lt.s32.totalorder %s1577_s29, 2  ;;  %s2040_s14 = smov (%p39_p9, %s37_s14), 0 }
  0x62   : > { %p1786_p2 = por %p2024_p1, %p51_p13  ;;  %p53_p6 = por %p52_p12, %p51_p13 }
  0x63   : > { %s279_s30 = sand.u32 1, %s1565_s26   ;;  %s41_s23 = ssub.s32 %s1573_s28, %s2040_s14 }
  0x64   : > { %p42_p8 = scmp.eq.s32.totalorder %s41_s23, 0  ;;  %s1127_s20 = sshll.u32 %s279_s30, 2 }
  0x65   : > { %s1128_s8 = sshll.u32 %s1573_s28, 6  ;;  %s283_s15 = scalar_lea.vmem [#allocation3], %s1127_s20 }
  0x66   : > { %s1798_s16 = scalar_select %p42_p8, %s1565_s26, %s44_s2  }
  0x67   : > { %s1803_s10 = scalar_lea.hbm %s1999_s0, %s1128_s8  ;;  %s290_s22 = sshll.u32 %s283_s15, 4  ;;  %s1805_s22 = int_to_ptr.vmem [resolvable:$true] %s290_s22 }
  0x68   : > { %p1809_p11 = pnand %p1279_p4, %p53_p6  ;;  %s280_s12 = scalar_lea.sflag [#allocation4], %s279_s30 }
  0x69   : > { %s1457_s24 = scalar_lea.hbm %s1803_s10, 64  ;;  %s1462_s20 = scalar_lea.hbm %s1999_s0, 128 }
  0x6a   : > { %p1458_p0 = scmp.ne.s32.totalorder %s1803_s10, %s1457_s24  ;;  %p1459_p3 = pneg %p1809_p11 }
  0x6b   : > { %p1463_p10 = scmp.lt.u32.totalorder %s1803_s10, %s1999_s0  ;;  %p1464_p13 = scmp.lt.u32.totalorder %s1462_s20, %s1457_s24 }
  0x6c   : > { %p1460_p5 = pnand %p1459_p3, %p1458_p0  ;;  %p1466_p12 = scmp.lt.u32.totalorder %s1457_s24, %s1803_s10 }
  0x6d   : > { %p1465_p9 = por %p1464_p13, %p1463_p10 }
  0x6e   : > { %p1461_p7 = pneg %p1460_p5 }
  0x6f   : > { %p1467_p1 = por %p1466_p12, %p1465_p9 }
  0x71   : > { %p1468_p4 = pnand %p1467_p1, %p1461_p7 }
  0x73   : > { %1471 = shalt.err (!%p1468_p4)
}
  0x74   : > { %s1472_s30 = scalar_lea.vmem %s1805_s22, 64  ;;  %s1584_s21 = smov [#allocation3]  }
  0x75   : > { %p1473_p6 = scmp.ne.s32.totalorder %s1805_s22, %s1472_s30  ;;  %s1477_s15 = sshll.u32 %s1584_s21, 4  ;;  %s1478_s15 = int_to_ptr.vmem [resolvable:$false] %s1477_s15 }
  0x76   : > { %s1479_s2 = scalar_lea.vmem %s1478_s15, 128  ;;  %p1480_p5 = scmp.lt.s32.totalorder %s1805_s22, %s1478_s15 }
  0x77   : > { %p1475_p8 = pnand %p1473_p6, %p1459_p3  ;;  %p1481_p10 = scmp.lt.s32.totalorder %s1479_s2, %s1472_s30 }
  0x79   : > { %p1476_p0 = pneg %p1475_p8  ;;  %p1482_p13 = por %p1481_p10, %p1480_p5 }
  0x7b   : > { %p1483_p9 = pnand %p1482_p13, %p1476_p0 }
  0x7d   : > { %1486 = shalt.err (!%p1483_p9)
}
  0x7e   : > { %1271 = dma.hbm_to_vmem [thread:$0]  (!%p1809_p11), %s1803_s10, 64, %s1805_s22, %s280_s12  }
  0x7f   : > { %p2027_p7 = scmp.ne.s32.totalorder %s2020_s13, 0 }
  0x80   : > { %s1841_s24 = sand.u32 (!%p2027_p7), 1, %s1561_s25   ;;  %p2028_p3 = scmp.ne.s32.totalorder (!%p2027_p7), %s2017_s11, 0 }
  0x81   : > { %305 = sbr.rel (%p2027_p7) target bundleno = 1641 (0x669), region = 48  ;;  %s1130_s23 = sshll.u32 (!%p2027_p7), %s1841_s24, 2 }
  0x82   : > { %s308_s20 = scalar_lea.sflag (!%p2027_p7), [#allocation4], %s1841_s24  ;;  %s311_s8 = scalar_lea.vmem (!%p2027_p7), [#allocation3], %s1130_s23 }
  0x88   : > { %1540 = dma.done.wait (%p2028_p3), %s308_s20, 64  }
  0x89   : > { %1542 = vsyncadd (%p2028_p3), %s308_s20, 4294967232  ;;  %p2029_p12 = scmp.ne.s32.totalorder %s2015_s9, 0 }
  0x8b   : > { %1544 = dma.done.wait (%p2029_p12), [#allocation7], 384  }
  0x8c   : > { %1546 = vsyncadd (%p2029_p12), [#allocation7], 4294966912 }
  0x8d   : > { %1548 = dma.done.wait (%p2029_p12), [#allocation10], 16  }
  0x8e   : > { %1550 = vsyncadd (%p2029_p12), [#allocation10], 4294967280  ;;  %v1585_v0 = vmov 0.0   ;;  %vm1586_vm0 = vmmov 0   ;;  %v1353_v1 = vld [vmem:[#allocation8] sm:$0xff]   ;;  %v1354_v2 = vld [vmem:[#allocation8 + $0x8] sm:$0xff]  }
  0x8f   : > { %1178 = vmatprep.subr.bf16.mxu0 %v1585_v0  ;;  %1182 = vmatprep.mubr.msk.bf16.mxu0 %vm1586_vm0, %v1585_v0  ;;  %v361_v3 = vld [vmem:[%s311_s8] sm:$0xf]  ;;  %vm389_vm1 = vcmask 261120   ;;  %s1587_s9 = smov 120   ;;  %s1588_s11 = smov 96   ;;  %vm446_vm2 = vcmask 64512  }
  0x90   : > { %1186 = vmatprep.subr.bf16.mxu1 %v1585_v0  ;;  %1188 = vmatprep.mubr.msk.bf16.mxu1 %vm1586_vm0, %v1585_v0  ;;  %v1135_v4 = vld [vmem:[#allocation9] ss:$0 sm:$0xff]  ;;  %s1589_s13 = smov 80   ;;  %s1590_s10 = smov 88   ;;  %v434_v22 = vld [vmem:[#allocation6] sm:$0xff]  ;;  %vm510_vm3 = vcmask 1043456  }
  0x91   : > { %1179 = vmatpush3.bf16.msra.mxu0 %v1353_v1  ;;  %s1591_s22 = smov 72   ;;  %s1592_s17 = smov 112   ;;  %vm900_vm4 = vcmask 130048   ;;  %vm903_vm5 = vcmask 195584  }
  0x92   : > { %1180 = vmatprep.subr.bf16.mxu0 %v1585_v0  ;;  %s1593_s12 = smov 104   ;;  %p357_p11 = scmp.lt.s32.totalorder %s1569_s27, 1 }
  0x93   : > { %s1594_s2 = smov 56   ;;  %s1595_s23 = smov 64  }
  0x94   : > { %s358_s19 = scalar_select %p357_p11, %s1569_s27, 1 }
  0x95   : > { %1181 = vmatpush3.bf16.msra.mxu0 %v1354_v2  ;;  %s1596_s20 = smov 40   ;;  %s1597_s8 = smov 48  }
  0x96   : > { %1192 = vmatprep.subr.bf16.mxu0 %v1585_v0  ;;  %s359_s15 = scalar_lea.vmem %s2000_s1, %s358_s19  ;;  %s1134_s19 = sshll.u32 %s1841_s24, 3 }
  0x97   : > { %v1139_v23 = vld [vmem:[%s359_s15] ss:$0 sm:$0xff]  ;;  %s1153_s15 = sshll.u32 %s1569_s27, 7  ;;  %s986_s27 = scalar_lea.sflag [#allocation5], %s1841_s24 }
  0x98   : > { %1183 = vmatmul.mubr.msk.bf16.vlgmr.msra.gmra.mrb[0].mxu0 %vm389_vm1, %v361_v3  ;;  %v442_v24 = vadd.f32 %v1139_v23, %v434_v22 }
  0x99   : > { %1194 = vmatprep.mubr.msk.bf16.mxu0 %vm1586_vm0, %v1585_v0 }
 0x16b   : > { %v427_v5 = vpop.f32.mrb[0].mxu0 }
 0x16c   : > { %v428_v6 = vadd.f32 %v1135_v4, %v427_v5  ;;  %v1184_v7 = vpop.f32.mrb[1].mxu0 }
 0x16d   : > { %v430_v8 = vpop.f32.mrb[2].mxu0 }
 0x16e   : > { %v1868_v9 = vpack.c.bf16 %v428_v6, %v428_v6  ;;  %v1185_v10 = vpop.f32.mrb[3].mxu0 }
 0x170   : > { %555 = vrot.lane.b32.xlu1 %v1868_v9, %s1587_s9  ;;  %444 = vrot.lane.b32.xlu0 %v1868_v9, %s1588_s11  ;;  %s1598_s9 = smov 8  }
 0x174   : > { %668 = vrot.lane.b32.xlu1 %v1868_v9, %s1589_s13  ;;  %557 = vrot.lane.b32.xlu0 %v1868_v9, %s1590_s10  ;;  %s1601_s13 = smov [#allocation11]  }
 0x175   : > { %s1491_s10 = sshll.u32 %s1601_s13, 4  ;;  %s1492_s10 = int_to_ptr.vmem [resolvable:$false] %s1491_s10 }
 0x178   : > { %779 = vrot.lane.b32.xlu1 %v1868_v9, %s1591_s22  ;;  %666 = vrot.lane.b32.xlu0 %v1868_v9, %s1592_s17  ;;  %s1599_s17 = smov 16   ;;  %s1493_s22 = scalar_lea.vmem %s1492_s10, 256 }
 0x17c   : > { %777 = vrot.lane.b32.xlu0 %v1868_v9, %s1593_s12  ;;  %s1600_s12 = smov 24  }
 0x1e2   : > { %v445_v11 = vpop.permute.xlu0 %444  ;;  %v556_v14 = vpop.permute.xlu1 %555 }
 0x1e3   : > { %v451_v12 = vsel %vm446_vm2, %v445_v11, 0 }
 0x1e4   : > { %1187 = vmatpush3.bf16.xpose.msra.mxu1 %v451_v12 }
 0x1e5   : > { %1198 = vmatprep.subr.bf16.mxu1 %v1585_v0 }
 0x1e6   : > { %v558_v13 = vpop.permute.xlu0 %557  ;;  %v669_v16 = vpop.permute.xlu1 %668 }
 0x1e7   : > { %v563_v15 = vsel %vm446_vm2, %v558_v13, 0  ;;  %v674_v17 = vsel %vm446_vm2, %v669_v16, 0 }
 0x1ea   : > { %v780_v18 = vpop.permute.xlu1 %779  ;;  %v667_v19 = vpop.permute.xlu0 %666 }
 0x1eb   : > { %1189 = vmatmul.mubr.msk.bf16.vlgmr.msra.gmra.mrb[0].mxu1 %vm446_vm2, %v1868_v9  ;;  %v785_v20 = vsel %vm446_vm2, %v780_v18, 0 }
 0x1ec   : > { %1199 = vmatpush3.bf16.xpose.msra.mxu1 %v563_v15  ;;  %1200 = vmatprep.mubr.msk.bf16.mxu1 %vm1586_vm0, %v1585_v0 }
 0x1ed   : > { %1210 = vmatprep.subr.bf16.mxu1 %v1585_v0 }
 0x1ee   : > { %v778_v21 = vpop.permute.xlu0 %777 }
 0x1f3   : > { %1201 = vmatmul.mubr.msk.bf16.vlgmr.msra.gmra.mrb[4].mxu1 %vm446_vm2, %v556_v14 }
 0x1f4   : > { %1211 = vmatpush3.bf16.xpose.msra.mxu1 %v674_v17  ;;  %1212 = vmatprep.mubr.msk.bf16.mxu1 %vm1586_vm0, %v1585_v0 }
 0x1f5   : > { %1222 = vmatprep.subr.bf16.mxu1 %v1585_v0 }
 0x1fb   : > { %1213 = vmatmul.mubr.msk.bf16.vlgmr.msra.gmra.mrb[8].mxu1 %vm446_vm2, %v667_v19 }
 0x1fc   : > { %1223 = vmatpush3.bf16.xpose.msra.mxu1 %v785_v20  ;;  %1224 = vmatprep.mubr.msk.bf16.mxu1 %vm1586_vm0, %v1585_v0 }
 0x1fd   : > { %1234 = vmatprep.subr.bf16.mxu1 %v1585_v0 }
 0x203   : > { %1225 = vmatmul.mubr.msk.bf16.vlgmr.msra.gmra.mrb[12].mxu1 %vm446_vm2, %v778_v21 }
 0x204   : > { %1238 = vmatprep.mubr.msk.bf16.mxu1 %vm1586_vm0, %v1585_v0 }
 0x2be   : > { %v487_v25 = vpop.f32.mrb[0].mxu1 }
 0x2bf   : > { %v488_v26 = vadd.f32 %v487_v25, %v442_v24  ;;  %v1190_v27 = vpop.f32.mrb[1].mxu1 }
 0x2c0   : > { %v490_v28 = vpop.f32.mrb[2].mxu1 }
 0x2c1   : > { %v1191_v29 = vpop.f32.mrb[3].mxu1  ;;  %v493_v30 = vsel %vm446_vm2, %v488_v26, -inf }
 0x2c2   : > { %494 = vmax.xlane.f32.xlu1 %v493_v30 }
 0x2c6   : > { %v599_v31 = vpop.f32.mrb[4].mxu1 }
 0x2c7   : > { %v600_v32 = vadd.f32 %v599_v31, %v442_v24  ;;  %v1202_v33 = vpop.f32.mrb[5].mxu1 }
 0x2c8   : > { %v602_v34 = vpop.f32.mrb[6].mxu1 }
 0x2c9   : > { %v1203_v35 = vpop.f32.mrb[7].mxu1  ;;  %v605_v36 = vsel %vm446_vm2, %v600_v32, -inf }
 0x2ca   : > { %606 = vmax.xlane.f32.xlu0 %v605_v36 }
 0x2ce   : > { %v710_v37 = vpop.f32.mrb[8].mxu1 }
 0x2cf   : > { %v711_v38 = vadd.f32 %v710_v37, %v442_v24  ;;  %v1214_v39 = vpop.f32.mrb[9].mxu1 }
 0x2d0   : > { %v713_v40 = vpop.f32.mrb[10].mxu1  ;;  %v1355_v39 = vld [vmem:[%s2004_s5] sm:$0xff]  }
 0x2d1   : > { %v1215_v41 = vpop.f32.mrb[11].mxu1  ;;  %v716_v42 = vsel %vm446_vm2, %v711_v38, -inf  ;;  %1235 = vmatpush3.bf16.msra.mxu1 %v1355_v39  ;;  %v1356_v40 = vld [vmem:[%s2004_s5 + $0x8] sm:$0xff]  }
 0x2d2   : > { %717 = vmax.xlane.f32.xlu0 %v716_v42  ;;  %1236 = vmatprep.subr.bf16.mxu1 %v1585_v0 }
 0x2d5   : > { %1237 = vmatpush3.bf16.msra.mxu1 %v1356_v40 }
 0x2d6   : > { %v821_v43 = vpop.f32.mrb[12].mxu1 }
 0x2d7   : > { %v822_v44 = vadd.f32 %v821_v43, %v442_v24  ;;  %v1226_v45 = vpop.f32.mrb[13].mxu1 }
 0x2d8   : > { %v824_v46 = vpop.f32.mrb[14].mxu1 }
 0x2d9   : > { %v1227_v47 = vpop.f32.mrb[15].mxu1  ;;  %v827_v48 = vsel %vm446_vm2, %v822_v44, -inf }
 0x2da   : > { %828 = vmax.xlane.f32.xlu1 %v827_v48 }
 0x34f   : > { %v495_v49 = vpop.xlane.xlu1 %494 }
 0x350   : > { %v496_v50 = vsub.f32 %v488_v26, %v495_v49 }
 0x352   : > { %v497_v51 = vmul.f32 1.442695, %v496_v50 }
 0x354   : > { %1357 = vpow2.f32 %v497_v51 }
 0x357   : > { %v607_v52 = vpop.xlane.xlu0 %606 }
 0x358   : > { %v608_v53 = vsub.f32 %v600_v32, %v607_v52 }
 0x35a   : > { %v609_v54 = vmul.f32 1.442695, %v608_v53 }
 0x35c   : > { %1359 = vpow2.f32 %v609_v54 }
 0x35e   : > { %v1358_v55 = vpop.eup %1357 }
 0x35f   : > { %v718_v56 = vpop.xlane.xlu0 %717  ;;  %v499_v57 = vsel %vm446_vm2, %v1358_v55, 0.0 }
 0x360   : > { %v719_v58 = vsub.f32 %v711_v38, %v718_v56  ;;  %500 = vadd.xlane.f32.xlu0 %v499_v57  ;;  %v1148_v57 = vld [vmem:[%s2005_s6] ss:$0 sm:$0xff] }
 0x362   : > { %v720_v59 = vmul.f32 1.442695, %v719_v58 }
 0x364   : > { %1361 = vpow2.f32 %v720_v59 }
 0x366   : > { %v1360_v60 = vpop.eup %1359 }
 0x367   : > { %v611_v61 = vsel %vm446_vm2, %v1360_v60, 0.0  ;;  %v829_v1 = vpop.xlane.xlu1 %828 }
 0x368   : > { %612 = vadd.xlane.f32.xlu1 %v611_v61  ;;  %v830_v2 = vsub.f32 %v822_v44, %v829_v1 }
 0x36a   : > { %v831_v3 = vmul.f32 1.442695, %v830_v2 }
 0x36c   : > { %1363 = vpow2.f32 %v831_v3 }
 0x36e   : > { %v1362_v62 = vpop.eup %1361 }
 0x36f   : > { %v722_v63 = vsel %vm446_vm2, %v1362_v62, 0.0 }
 0x370   : > { %723 = vadd.xlane.f32.xlu0 %v722_v63 }
 0x376   : > { %v1364_v4 = vpop.eup %1363 }
 0x377   : > { %v833_v5 = vsel %vm446_vm2, %v1364_v4, 0.0 }
 0x379   : > { %617 = vrot.lane.b32.xlu1 %v1868_v9, %s1594_s2  ;;  %s356_s2 = scalar_lea.vmem [#allocation11], %s1134_s19 }
 0x386   : > { %505 = vrot.lane.b32.xlu0 %v1868_v9, %s1595_s23  ;;  %s999_s23 = sshll.u32 %s356_s2, 4  ;;  %s1951_s23 = int_to_ptr.vmem [resolvable:$true] %s999_s23 }
 0x387   : > { %s1487_s11 = scalar_lea.vmem %s1951_s23, 128  ;;  %p1494_p8 = scmp.lt.s32.totalorder %s1951_s23, %s1492_s10 }
 0x388   : > { %p1488_p1 = scmp.ne.s32.totalorder %s1951_s23, %s1487_s11  ;;  %p1495_p0 = scmp.lt.s32.totalorder %s1493_s22, %s1487_s11 }
 0x38a   : > { %839 = vrot.lane.b32.xlu0 %v1868_v9, %s1596_s20  ;;  %p1489_p4 = pnand %p1488_p1, %p1786_p2  ;;  %p1496_p5 = por %p1495_p0, %p1494_p8 }
 0x38c   : > { %p1490_p6 = pneg %p1489_p4 }
 0x38e   : > { %p1497_p10 = pnand %p1496_p5, %p1490_p6 }
 0x39d   : > { %834 = vadd.xlane.f32.xlu1 %v833_v5 }
 0x3ae   : > { %728 = vrot.lane.b32.xlu1 %v1868_v9, %s1597_s8 }
 0x3ed   : > { %v501_v6 = vpop.xlane.xlu0 %500 }
 0x3ee   : > { %1365 = vrcp.f32 %v501_v6 }
 0x3f5   : > { %v613_v7 = vpop.xlane.xlu1 %612 }
 0x3f6   : > { %1367 = vrcp.f32 %v613_v7 }
 0x3f8   : > { %v1366_v8 = vpop.eup %1365 }
 0x3f9   : > { %v503_v11 = vmul.f32 %v1366_v8, %v1358_v55  ;;  %v618_v14 = vpop.permute.xlu1 %617 }
 0x3fa   : > { %v623_v17 = vsel %vm510_vm3, %v618_v14, 0 }
 0x3fb   : > { %v504_v15 = vpack.c.bf16 %v503_v11, %v503_v11 }
 0x3fd   : > { %v724_v10 = vpop.xlane.xlu0 %723 }
 0x3fe   : > { %1369 = vrcp.f32 %v724_v10 }
 0x400   : > { %v1368_v16 = vpop.eup %1367 }
 0x401   : > { %v506_v12 = vpop.permute.xlu0 %505  ;;  %v615_v9 = vmul.f32 %v1368_v16, %v1360_v60 }
 0x402   : > { %v512_v13 = vsel %vm510_vm3, %v506_v12, 0 }
 0x403   : > { %1193 = vmatpush3.bf16.msra.mxu0 %v512_v13  ;;  %v616_v18 = vpack.c.bf16 %v615_v9, %v615_v9 }
 0x404   : > { %1204 = vmatprep.subr.bf16.mxu0 %v1585_v0 }
 0x405   : > { %v840_v24 = vpop.permute.xlu0 %839 }
 0x406   : > { %1195 = vmatmul.mubr.msk.bf16.vlgmr.msra.gmra.mrb[4].mxu0 %vm446_vm2, %v504_v15  ;;  %v845_v26 = vsel %vm510_vm3, %v840_v24, 0 }
 0x407   : > { %1205 = vmatpush3.bf16.msra.mxu0 %v623_v17  ;;  %1206 = vmatprep.mubr.msk.bf16.mxu0 %vm1586_vm0, %v1585_v0 }
 0x408   : > { %1216 = vmatprep.subr.bf16.mxu0 %v1585_v0  ;;  %v1370_v19 = vpop.eup %1369 }
 0x409   : > { %v726_v21 = vmul.f32 %v1370_v19, %v1362_v62 }
 0x40b   : > { %v727_v25 = vpack.c.bf16 %v726_v21, %v726_v21 }
 0x40e   : > { %1207 = vmatmul.mubr.msk.bf16.vlgmr.msra.gmra.mrb[8].mxu0 %vm446_vm2, %v616_v18 }
 0x40f   : > { %1218 = vmatprep.mubr.msk.bf16.mxu0 %vm1586_vm0, %v1585_v0 }
 0x42a   : > { %v835_v20 = vpop.xlane.xlu1 %834 }
 0x42b   : > { %1371 = vrcp.f32 %v835_v20 }
 0x42e   : > { %v729_v22 = vpop.permute.xlu1 %728 }
 0x42f   : > { %v734_v23 = vsel %vm510_vm3, %v729_v22, 0 }
 0x430   : > { %1217 = vmatpush3.bf16.msra.mxu0 %v734_v23 }
 0x431   : > { %1228 = vmatprep.subr.bf16.mxu0 %v1585_v0 }
 0x433   : > { %1219 = vmatmul.mubr.msk.bf16.vlgmr.msra.gmra.mrb[12].mxu0 %vm446_vm2, %v727_v25 }
 0x434   : > { %1229 = vmatpush3.bf16.msra.mxu0 %v845_v26  ;;  %1230 = vmatprep.mubr.msk.bf16.mxu0 %vm1586_vm0, %v1585_v0 }
 0x435   : > { %v1372_v27 = vpop.eup %1371 }
 0x436   : > { %v837_v28 = vmul.f32 %v1372_v27, %v1364_v4 }
 0x438   : > { %v838_v29 = vpack.c.bf16 %v837_v28, %v837_v28 }
 0x43b   : > { %1231 = vmatmul.mubr.msk.bf16.vlgmr.msra.gmra.mrb[16].mxu0 %vm446_vm2, %v838_v29 }
 0x4d9   : > { %v548_v30 = vpop.f32.mrb[4].mxu0 }
 0x4da   : > { %v1196_v31 = vpop.f32.mrb[5].mxu0  ;;  %v554_v52 = vpack.c.bf16 %v548_v30, %v548_v30 }
 0x4db   : > { %v551_v32 = vpop.f32.mrb[6].mxu0 }
 0x4dc   : > { %v1197_v33 = vpop.f32.mrb[7].mxu0 }
 0x4e1   : > { %v659_v34 = vpop.f32.mrb[8].mxu0 }
 0x4e2   : > { %v665_v35 = vpack.c.bf16 %v659_v34, %v659_v34  ;;  %v1208_v36 = vpop.f32.mrb[9].mxu0 }
 0x4e3   : > { %v662_v37 = vpop.f32.mrb[10].mxu0 }
 0x4e4   : > { %889 = vrot.lane.b32.xlu1 %v665_v35, %s1598_s9  ;;  %v1209_v38 = vpop.f32.mrb[11].mxu0  ;;  %s1949_s9 = scalar_lea.hbm %s2006_s7, %s1153_s15 }
 0x506   : > { %v770_v41 = vpop.f32.mrb[12].mxu0 }
 0x507   : > { %v776_v42 = vpack.c.bf16 %v770_v41, %v770_v41  ;;  %v1220_v43 = vpop.f32.mrb[13].mxu0 }
 0x508   : > { %v773_v44 = vpop.f32.mrb[14].mxu0 }
 0x509   : > { %892 = vrot.lane.b32.xlu0 %v776_v42, %s1599_s17  ;;  %v1221_v45 = vpop.f32.mrb[15].mxu0 }
 0x50e   : > { %v881_v46 = vpop.f32.mrb[16].mxu0 }
 0x50f   : > { %v887_v47 = vpack.c.bf16 %v881_v46, %v881_v46  ;;  %v1232_v48 = vpop.f32.mrb[17].mxu0 }
 0x510   : > { %v884_v49 = vpop.f32.mrb[18].mxu0 }
 0x511   : > { %895 = vrot.lane.b32.xlu1 %v887_v47, %s1600_s12  ;;  %v1233_v50 = vpop.f32.mrb[19].mxu0 }
 0x556   : > { %v890_v51 = vpop.permute.xlu1 %889 }
 0x557   : > { %v899_v53 = vsel %vm446_vm2, %v554_v52, %v890_v51 }
 0x57b   : > { %v893_v0 = vpop.permute.xlu0 %892 }
 0x57c   : > { %v902_v54 = vsel %vm900_vm4, %v899_v53, %v893_v0 }
 0x583   : > { %v896_v55 = vpop.permute.xlu1 %895 }
 0x584   : > { %v905_v56 = vsel %vm903_vm5, %v902_v54, %v896_v55 }
 0x585   : > { %1239 = vmatmul.mubr.msk.bf16.vlgmr.msra.gmra.mrb[16].mxu1 %vm389_vm1, %v905_v56 }
 0x658   : > { %v978_v58 = vpop.f32.mrb[16].mxu1 }
 0x659   : > { %v979_v59 = vadd.f32 %v1148_v57, %v978_v58  ;;  %v1240_v60 = vpop.f32.mrb[17].mxu1 }
 0x65a   : > { %v981_v61 = vpop.f32.mrb[18].mxu1 }
 0x65b   : > { %v1241_v62 = vpop.f32.mrb[19].mxu1  ;;  %984 = vst.msk [vmem:[%s356_s2] sm:$0xff] %vm389_vm1, %v979_v59 }
 0x65c   : > { %1500 = shalt.err (!%p1497_p10)
}
 0x65d   : > { %s1501_s24 = scalar_lea.hbm %s1949_s9, 128  ;;  %s1505_s19 = scalar_lea.hbm %s2006_s7, 256 }
 0x65e   : > { %p1502_p13 = scmp.ne.s32.totalorder %s1949_s9, %s1501_s24  ;;  %p1506_p3 = scmp.lt.u32.totalorder %s1949_s9, %s2006_s7 }
 0x65f   : > { %p1507_p12 = scmp.lt.u32.totalorder %s1505_s19, %s1501_s24  ;;  %p1509_p1 = scmp.lt.u32.totalorder %s1501_s24, %s1949_s9 }
 0x660   : > { %p1503_p9 = pnand %p1502_p13, %p1786_p2 }
 0x661   : > { %p1508_p11 = por %p1507_p12, %p1506_p3 }
 0x662   : > { %p1504_p7 = pneg %p1503_p9 }
 0x663   : > { %p1510_p4 = por %p1509_p1, %p1508_p11 }
 0x665   : > { %p1511_p6 = pnand %p1510_p4, %p1504_p7 }
 0x667   : > { %1514 = shalt.err (!%p1511_p6)
}
 0x668   : > { %1256 = dma.vmem_to_hbm [thread:$0]  (%p1786_p2), %s1951_s23, 128, %s1949_s9, %s986_s27  }
 0x669 PF: > { %s2030_s15 = sld [smem:[#allocation16_spill]]  ;;  %s2031_s2 = sld [smem:[#allocation17_spill]] }
 0x66a   : > { %p2033_p0 = scmp.ge.s32.totalorder %s1577_s29, 2 }
 0x66f   : > { %s1011_s20 = sand.u32 1, %s2030_s15   ;;  %p2032_p8 = scmp.ne.s32.totalorder %s2031_s2, 0 }
 0x670   : > { %s1012_s8 = scalar_lea.sflag [#allocation5], %s1011_s20 }
 0x671   : > { %p1273_p5 = pnand %p2033_p0, %p2032_p8 }
 0x673   : > { %1552 = dma.done.wait (!%p1273_p5), %s1012_s8, 128  }
 0x674   : > { %1554 = vsyncadd (!%p1273_p5), %s1012_s8, 4294967168  ;;  %s25_s29 = sadd.s32 1, %s1577_s29   ;;  %s2034_s24 = smov %s1561_s25 }
 0x675   : > { %p22_p10 = scmp.ge.s32.totalorder %s25_s29, 4   ;;  %s2035_s25 = smov %s1565_s26 }
 0x676   : > { %s2036_s26 = smov %s1798_s16  ;;  %s2037_s27 = smov %s1573_s28 }
 0x677   : > { %s2038_s28 = smov %s2040_s14  ;;  %24 = sbr.rel (!%p22_p10) target bundleno = 10 (0xa), region = 119 }
 0x67e   :  { %1017 = vsyncpa [#allocation4], 1 }
 0x67f   :  { %1019 = vsyncpa [#allocation4 + $0x1], 1 }
 0x680   :  { %1020 = vsyncpa [#allocation7], 1 }
 0x681   :  { %1021 = vsyncpa [#allocation10], 1 }
 0x682   :  { %1022 = vsyncpa [#allocation5], 1 }
 0x683   :  { %1024 = vsyncpa [#allocation5 + $0x1], 1 }

</bundles_post_ra>
